<compile_context>
chip_gen: v5e
topology: v5e:2x2
jax: 0.10.0
libtpu: 0.0.40
codegen_flags: <defaults>
</compile_context>

<pallas_src>
import functools

import jax
import jax.numpy as jnp
from jax.experimental import pallas as pl
from jax.experimental.pallas import tpu as pltpu


def _round_up(x, m):
    return ((x + m - 1) // m) * m


# ---------------------------------------------------------------------------
# Fused kernel: n_layers x (valid Conv1d + ReLU) for one (batch, time-tile).
# refs = (x_main, x_halo, w0, b0, w1, b1, ..., out)
# ---------------------------------------------------------------------------
def _conv_stack_kernel(*refs, n_layers, K, TT):
    x_main_ref, x_halo_ref = refs[0], refs[1]
    o_ref = refs[-1]
    wb_refs = refs[2:-1]

    # (TT + H, C0) input window for this tile; the halo supplies the K-1 rows
    # each of the n_layers valid convolutions consumes.
    cur = jnp.concatenate([x_main_ref[0], x_halo_ref[0]], axis=0).astype(jnp.float32)

    for l in range(n_layers):
        w_ref = wb_refs[2 * l]        # (K*Cin, Cout), bf16
        b_ref = wb_refs[2 * l + 1]    # (1, Cout), f32
        L_out = cur.shape[0] - (K - 1)
        # im2col along the channel (lane) axis -> one deep MXU matmul per layer
        cols = jnp.concatenate([cur[k:k + L_out, :] for k in range(K)], axis=1)
        acc = jnp.dot(cols.astype(jnp.bfloat16), w_ref[...],
                      preferred_element_type=jnp.float32)
        cur = jnp.maximum(acc + b_ref[...], 0.0)          # f32 bias + ReLU

    o_ref[0] = cur[:TT, :].astype(o_ref.dtype)


def _estimate_vmem_bytes(TT, H, C0, layer_dims, K, C_last):
    # double-buffered inputs/outputs + weights + in-kernel temporaries
    est = 2 * (TT + H) * C0 * 4 + 2 * TT * C_last * 4
    tmp = 0
    for cin, cout in layer_dims:
        est += 2 * (K * cin * cout * 2 + cout * 4)
        tmp = max(tmp, (TT + H) * (cin * 4 + K * cin * (4 + 2) + cout * 4))
    return est + tmp


def conv_stack_fused(x, params, *, w_context, out_len, time_tile=256):
    """Apply n_layers of [valid Conv1d(k=w_context, stride 1) + ReLU].

    x: (B, T_in, C0) f32 channels-last.  params: list of (w, b) with
    w: (K, Cin, Cout), b: (Cout,).  Returns (B, out_len, C_last).
    Rows of x beyond T_in are treated as zero padding (matches F.pad).
    """
    B, T_in, C0 = x.shape
    K = w_context
    n_layers = len(params)
    rf = n_layers * (K - 1)                       # receptive-field growth
    assert out_len >= 1

    # Halo rows per tile (multiple of 8 sublanes); time tile is a multiple of
    # the halo so the halo's block index ((j+1)*TT/H) is exact.
    H = _round_up(max(rf, 1), 8)
    TT = max(H, _round_up(min(time_tile, out_len), H))
    assert TT % H == 0
    n_t = pl.cdiv(out_len, TT)
    ratio = TT // H

    # Size the (zero-padded) input so every main/halo block is fully in bounds.
    T_need = n_t * TT + H
    if T_in < T_need:
        x = jnp.pad(x, ((0, 0), (0, T_need - T_in), (0, 0)))
    elif T_in > T_need:
        x = x[:, :T_need, :]

    # Fold each layer's taps into one (K*Cin, Cout) bf16 matrix; bias in f32.
    w2ds, b2ds, layer_dims = [], [], []
    for (w, b) in params:
        Kw, cin, cout = w.shape
        assert Kw == K
        w2ds.append(w.reshape(K * cin, cout).astype(jnp.bfloat16))
        b2ds.append(b.reshape(1, cout).astype(jnp.float32))
        layer_dims.append((cin, cout))
    C_last = layer_dims[-1][1]

    in_specs = [
        pl.BlockSpec((1, TT, C0), lambda b_, j: (b_, j, 0)),            # main tile
        pl.BlockSpec((1, H, C0), lambda b_, j: (b_, (j + 1) * ratio, 0)),  # halo
    ]
    operands = [x, x]
    for w2, b2 in zip(w2ds, b2ds):
        # Grid-invariant operands (constant index_map): Pallas keeps them
        # resident, no per-step re-DMA.
        in_specs.append(pl.BlockSpec(w2.shape, lambda b_, j: (0, 0)))
        in_specs.append(pl.BlockSpec(b2.shape, lambda b_, j: (0, 0)))
        operands.append(w2)
        operands.append(b2)

    est = _estimate_vmem_bytes(TT, H, C0, layer_dims, K, C_last)
    vmem_limit = int(min(max(2 * est, 32 * 1024 * 1024), 48 * 1024 * 1024))

    kernel = functools.partial(_conv_stack_kernel, n_layers=n_layers, K=K, TT=TT)
    return pl.pallas_call(
        kernel,
        out_shape=jax.ShapeDtypeStruct((B, out_len, C_last), x.dtype),
        grid_spec=pltpu.PrefetchScalarGridSpec(
            num_scalar_prefetch=0,
            grid=(B, n_t),
            in_specs=in_specs,
            out_specs=pl.BlockSpec((1, TT, C_last), lambda b_, j: (b_, j, 0)),
        ),
        compiler_params=pltpu.CompilerParams(
            dimension_semantics=("parallel", "parallel"),
            vmem_limit_bytes=vmem_limit,
        ),
    )(*operands)


# ---------------------------------------------------------------------------
# Module-level forward (matches torch Conv1d.forward semantics).
# ---------------------------------------------------------------------------
def conv_encoder_forward(feats, feat_lengths, params, *, n_layers, w_context,
                         pad="same", time_tile=256):
    """feats: (B, T, d_input) -> (outputs (B, T, d_hidden), output_lengths)."""
    K = w_context
    if pad == "same":
        input_length = feats.shape[1]
        # The module pads n_layers*K zero rows at the end and slices back to
        # input_length; the fused kernel zero-pads internally (>= the
        # n_layers*(K-1) rows that can influence the first T outputs), which
        # is numerically identical for the retained rows.
        outputs = conv_stack_fused(feats, params, w_context=K,
                                   out_len=input_length, time_tile=time_tile)
        output_lengths = feat_lengths
    else:
        out_len = feats.shape[1] - n_layers * (K - 1)
        outputs = conv_stack_fused(feats, params, w_context=K,
                                   out_len=out_len, time_tile=time_tile)
        # TODO(synk): PyTorch's non-'same' branch uses self.padding/self.subsample
        # which are never defined in __init__ (would raise); length formula is not
        # reproducible, so input lengths are passed through unchanged.
        output_lengths = feat_lengths
    return outputs, output_lengths


# ---------------------------------------------------------------------------
# Deterministic parameter init (PyTorch Conv1d default: U(-1/sqrt(fan_in), ...)).
# Weights stored as (K, Cin, Cout) == torch weight (Cout, Cin, K) transposed.
# ---------------------------------------------------------------------------
def init_params(key, d_input, d_hidden, n_layers, w_context):
    params = []
    cin = d_input
    for _ in range(n_layers):
        key, kw, kb = jax.random.split(key, 3)
        fan_in = cin * w_context
        bound = 1.0 / (fan_in ** 0.5)
        w = jax.random.uniform(kw, (w_context, cin, d_hidden), jnp.float32,
                               -bound, bound)
        b = jax.random.uniform(kb, (d_hidden,), jnp.float32, -bound, bound)
        params.append((w, b))
        cin = d_hidden
    return params


# ---------------------------------------------------------------------------
# References for correctness checks.
# ---------------------------------------------------------------------------
def _ref_forward_f32(feats, feat_lengths, params, *, n_layers, w_context):
    """Plain-JAX f32 mirror of the torch module."""
    input_length = feats.shape[1]
    x = jnp.pad(feats, ((0, 0), (0, n_layers * w_context), (0, 0)))
    for (w, b) in params:
        y = jax.lax.conv_general_dilated(
            x, w, window_strides=(1,), padding="VALID",
            dimension_numbers=("NWC", "WIO", "NWC"))
        x = jnp.maximum(y + b[None, None, :], 0.0)
    return x[:, :input_length, :], feat_lengths


def _ref_forward_bf16(feats, feat_lengths, params, *, n_layers, w_context):
    """Mirrors the kernel numerics: bf16 matmul operands, f32 accumulation."""
    input_length = feats.shape[1]
    K = w_context
    x = jnp.pad(feats, ((0, 0), (0, n_layers * K), (0, 0)))
    for (w, b) in params:
        T_out = x.shape[1] - K + 1
        cols = jnp.concatenate([x[:, k:k + T_out, :] for k in range(K)], axis=-1)
        w2 = w.reshape(K * w.shape[1], w.shape[2])
        y = jnp.einsum("btc,co->bto", cols.astype(jnp.bfloat16),
                       w2.astype(jnp.bfloat16),
                       preferred_element_type=jnp.float32)
        x = jnp.maximum(y + b[None, None, :], 0.0)
    return x[:, :input_length, :], feat_lengths


if __name__ == "__main__":
    # Small shapes consistent with the module's forward: feats (B, T, d_input).
    B, T = 2, 16
    d_input, d_hidden = 8, 32
    n_layers, w_context = 2, 3

    key = jax.random.PRNGKey(0)
    key, kx = jax.random.split(key)
    feats = jax.random.normal(kx, (B, T, d_input), jnp.float32)
    feat_lengths = jnp.array([16, 12], jnp.int32)

    params = init_params(key, d_input, d_hidden, n_layers, w_context)

    fwd = functools.partial(conv_encoder_forward, n_layers=n_layers,
                            w_context=w_context, pad="same")
    outputs, output_lengths = fwd(feats, feat_lengths, params)
    outputs = jax.block_until_ready(outputs)
    output_lengths = jax.block_until_ready(output_lengths)

    assert outputs.shape == (B, T, d_hidden), outputs.shape

    # Tight check against a bf16-operand / f32-accumulation mirror of the kernel,
    # and a loose check against the full-f32 torch-faithful reference.
    ref_bf16, _ = _ref_forward_bf16(feats, feat_lengths, params,
                                    n_layers=n_layers, w_context=w_context)
    ref_f32, ref_len = _ref_forward_f32(feats, feat_lengths, params,
                                        n_layers=n_layers, w_context=w_context)
    assert jnp.allclose(outputs, ref_bf16, atol=5e-3, rtol=5e-3), \
        float(jnp.max(jnp.abs(outputs - ref_bf16)))
    assert jnp.allclose(outputs, ref_f32, atol=5e-2, rtol=5e-2), \
        float(jnp.max(jnp.abs(outputs - ref_f32)))
    assert jnp.array_equal(output_lengths, ref_len)

    print("KERNEL_OK")
</pallas_src>

<mosaic_0001>
module attributes {stable_mosaic.version = 11 : i64} {
  func.func @_conv_stack_kernel(%arg0: i32, %arg1: i32, %arg2: memref<1x16x8xf32, #tpu.memory_space<vmem>>, %arg3: memref<1x8x8xf32, #tpu.memory_space<vmem>>, %arg4: memref<24x32xbf16, #tpu.memory_space<vmem>>, %arg5: memref<1x32xf32, #tpu.memory_space<vmem>>, %arg6: memref<96x32xbf16, #tpu.memory_space<vmem>>, %arg7: memref<1x32xf32, #tpu.memory_space<vmem>>, %arg8: memref<1x16x32xf32, #tpu.memory_space<vmem>>) attributes {dimension_semantics = [#tpu.dimension_semantics<parallel>, #tpu.dimension_semantics<parallel>], iteration_bounds = array<i64: 2, 1>, scalar_prefetch = 0 : i64, scratch_operands = 0 : i64, tpu.core_type = #tpu.core_type<tc>, window_params = [{transform_indices = @transform_0, window_bounds = array<i64: 1, 16, 8>}, {transform_indices = @transform_1, window_bounds = array<i64: 1, 8, 8>}, {pipeline_mode = #tpu.pipeline_mode<synchronous>, transform_indices = @transform_2, window_bounds = array<i64: 24, 32>}, {pipeline_mode = #tpu.pipeline_mode<synchronous>, transform_indices = @transform_3, window_bounds = array<i64: 1, 32>}, {pipeline_mode = #tpu.pipeline_mode<synchronous>, transform_indices = @transform_4, window_bounds = array<i64: 96, 32>}, {pipeline_mode = #tpu.pipeline_mode<synchronous>, transform_indices = @transform_5, window_bounds = array<i64: 1, 32>}, {transform_indices = @transform_6, window_bounds = array<i64: 1, 16, 32>}]} {
    %c0 = arith.constant 0 : index
    %c0_0 = arith.constant 0 : index
    %c0_1 = arith.constant 0 : index
    %0 = vector.load %arg2[%c0, %c0_0, %c0_1] : memref<1x16x8xf32, #tpu.memory_space<vmem>>, vector<1x16x8xf32>
    %1 = vector.shape_cast %0 : vector<1x16x8xf32> to vector<16x8xf32>
    %c0_2 = arith.constant 0 : index
    %c0_3 = arith.constant 0 : index
    %c0_4 = arith.constant 0 : index
    %2 = vector.load %arg3[%c0_2, %c0_3, %c0_4] : memref<1x8x8xf32, #tpu.memory_space<vmem>>, vector<1x8x8xf32>
    %3 = vector.shape_cast %2 : vector<1x8x8xf32> to vector<8x8xf32>
    %4 = tpu.concatenate %1, %3 in 0 : vector<16x8xf32>, vector<8x8xf32> -> vector<24x8xf32>
    %5 = vector.extract_strided_slice %4 {offsets = [0, 0], sizes = [22, 8], strides = [1, 1]} : vector<24x8xf32> to vector<22x8xf32>
    %6 = vector.extract_strided_slice %4 {offsets = [1, 0], sizes = [22, 8], strides = [1, 1]} : vector<24x8xf32> to vector<22x8xf32>
    %7 = vector.extract_strided_slice %4 {offsets = [2, 0], sizes = [22, 8], strides = [1, 1]} : vector<24x8xf32> to vector<22x8xf32>
    %8 = tpu.concatenate %5, %6, %7 in 1 : vector<22x8xf32>, vector<22x8xf32>, vector<22x8xf32> -> vector<22x24xf32>
    %9 = arith.truncf %8 : vector<22x24xf32> to vector<22x24xbf16>
    %c0_5 = arith.constant 0 : index
    %c0_6 = arith.constant 0 : index
    %10 = vector.load %arg4[%c0_5, %c0_6] : memref<24x32xbf16, #tpu.memory_space<vmem>>, vector<24x32xbf16>
    %cst = arith.constant dense<0.000000e+00> : vector<22x32xf32>
    %11 = tpu.matmul %9, %10, %cst {dimension_numbers = #tpu.dot_dimension_numbers<[1], [0], [0], [1], [0, 0, 1, 1], [], []>} : vector<22x24xbf16>, vector<24x32xbf16>, vector<22x32xf32> -> vector<22x32xf32>
    %c0_7 = arith.constant 0 : index
    %c0_8 = arith.constant 0 : index
    %12 = vector.load %arg5[%c0_7, %c0_8] : memref<1x32xf32, #tpu.memory_space<vmem>>, vector<1x32xf32>
    %13 = vector.broadcast %12 : vector<1x32xf32> to vector<22x32xf32>
    %14 = arith.addf %11, %13 : vector<22x32xf32>
    %cst_9 = arith.constant 0.000000e+00 : f32
    %15 = vector.broadcast %cst_9 : f32 to vector<22x32xf32>
    %16 = arith.maximumf %14, %15 : vector<22x32xf32>
    %17 = vector.extract_strided_slice %16 {offsets = [0, 0], sizes = [20, 32], strides = [1, 1]} : vector<22x32xf32> to vector<20x32xf32>
    %18 = vector.extract_strided_slice %16 {offsets = [1, 0], sizes = [20, 32], strides = [1, 1]} : vector<22x32xf32> to vector<20x32xf32>
    %19 = vector.extract_strided_slice %16 {offsets = [2, 0], sizes = [20, 32], strides = [1, 1]} : vector<22x32xf32> to vector<20x32xf32>
    %20 = tpu.concatenate %17, %18, %19 in 1 : vector<20x32xf32>, vector<20x32xf32>, vector<20x32xf32> -> vector<20x96xf32>
    %21 = arith.truncf %20 : vector<20x96xf32> to vector<20x96xbf16>
    %c0_10 = arith.constant 0 : index
    %c0_11 = arith.constant 0 : index
    %22 = vector.load %arg6[%c0_10, %c0_11] : memref<96x32xbf16, #tpu.memory_space<vmem>>, vector<96x32xbf16>
    %cst_12 = arith.constant dense<0.000000e+00> : vector<20x32xf32>
    %23 = tpu.matmul %21, %22, %cst_12 {dimension_numbers = #tpu.dot_dimension_numbers<[1], [0], [0], [1], [0, 0, 1, 1], [], []>} : vector<20x96xbf16>, vector<96x32xbf16>, vector<20x32xf32> -> vector<20x32xf32>
    %c0_13 = arith.constant 0 : index
    %c0_14 = arith.constant 0 : index
    %24 = vector.load %arg7[%c0_13, %c0_14] : memref<1x32xf32, #tpu.memory_space<vmem>>, vector<1x32xf32>
    %25 = vector.broadcast %24 : vector<1x32xf32> to vector<20x32xf32>
    %26 = arith.addf %23, %25 : vector<20x32xf32>
    %cst_15 = arith.constant 0.000000e+00 : f32
    %27 = vector.broadcast %cst_15 : f32 to vector<20x32xf32>
    %28 = arith.maximumf %26, %27 : vector<20x32xf32>
    %29 = vector.extract_strided_slice %28 {offsets = [0, 0], sizes = [16, 32], strides = [1, 1]} : vector<20x32xf32> to vector<16x32xf32>
    %c0_16 = arith.constant 0 : index
    %c0_17 = arith.constant 0 : index
    %c0_18 = arith.constant 0 : index
    %30 = vector.load %arg8[%c0_16, %c0_17, %c0_18] : memref<1x16x32xf32, #tpu.memory_space<vmem>>, vector<1x16x32xf32>
    %31 = vector.shape_cast %30 : vector<1x16x32xf32> to vector<16x32xf32>
    %32 = vector.shape_cast %29 : vector<16x32xf32> to vector<1x16x32xf32>
    tpu.vector_store %arg8[%c0_16, %c0_17, %c0_18], %32 {strides = array<i32>} : memref<1x16x32xf32, #tpu.memory_space<vmem>>, vector<1x16x32xf32>,
    return
  }
  func.func @transform_0(%arg0: i32, %arg1: i32) -> (i32, i32, i32) {
    %c0_i32 = arith.constant 0 : i32
    %c0_i32_0 = arith.constant 0 : i32
    return %arg0, %arg1, %c0_i32 : i32, i32, i32
  }
  func.func @transform_1(%arg0: i32, %arg1: i32) -> (i32, i32, i32) {
    %c1_i32 = arith.constant 1 : i32
    %0 = arith.addi %arg1, %c1_i32 : i32
    %c2_i32 = arith.constant 2 : i32
    %1 = arith.muli %0, %c2_i32 : i32
    %c0_i32 = arith.constant 0 : i32
    %c0_i32_0 = arith.constant 0 : i32
    return %arg0, %1, %c0_i32 : i32, i32, i32
  }
  func.func @transform_2(%arg0: i32, %arg1: i32) -> (i32, i32) {
    %c0_i32 = arith.constant 0 : i32
    %c0_i32_0 = arith.constant 0 : i32
    %c0_i32_1 = arith.constant 0 : i32
    return %c0_i32, %c0_i32_0 : i32, i32
  }
  func.func @transform_3(%arg0: i32, %arg1: i32) -> (i32, i32) {
    %c0_i32 = arith.constant 0 : i32
    %c0_i32_0 = arith.constant 0 : i32
    %c0_i32_1 = arith.constant 0 : i32
    return %c0_i32, %c0_i32_0 : i32, i32
  }
  func.func @transform_4(%arg0: i32, %arg1: i32) -> (i32, i32) {
    %c0_i32 = arith.constant 0 : i32
    %c0_i32_0 = arith.constant 0 : i32
    %c0_i32_1 = arith.constant 0 : i32
    return %c0_i32, %c0_i32_0 : i32, i32
  }
  func.func @transform_5(%arg0: i32, %arg1: i32) -> (i32, i32) {
    %c0_i32 = arith.constant 0 : i32
    %c0_i32_0 = arith.constant 0 : i32
    %c0_i32_1 = arith.constant 0 : i32
    return %c0_i32, %c0_i32_0 : i32, i32
  }
  func.func @transform_6(%arg0: i32, %arg1: i32) -> (i32, i32, i32) {
    %c0_i32 = arith.constant 0 : i32
    %c0_i32_0 = arith.constant 0 : i32
    return %arg0, %arg1, %c0_i32 : i32, i32, i32
  }
}

</mosaic_0001>

<bundles_post_ra>
// kernel: tpu_custom_call.1
= control target key start
LH: loop header
LB: loop body
LE: loop exit
PB: predicated region body
PF: predicated region fallthrough
CT: control target
= control target key end

     0   :  { %11 = vsyncpa [#allocation3], 0  ;;  %s1094_s0 = inlined_call_operand.vmem [shape: f32[2,24,8], index: 0, kind: input, shape index: {}]   ;;  %s1095_s1 = inlined_call_operand.vmem [shape: f32[2,24,8], index: 1, kind: input, shape index: {}]   ;;  %s1096_s2 = inlined_call_operand.vmem [shape: bf16[24,32], index: 2, kind: input, shape index: {}]   ;;  %s1097_s3 = inlined_call_operand.vmem [shape: f32[1,32], index: 3, kind: input, shape index: {}]   ;;  %s1098_s4 = inlined_call_operand.vmem [shape: bf16[96,32], index: 4, kind: input, shape index: {}]   ;;  %s1099_s5 = inlined_call_operand.vmem [shape: f32[1,32], index: 5, kind: input, shape index: {}]   ;;  %s1100_s6 = inlined_call_operand.hbm [shape: f32[2,16,32], index: 6, kind: output, shape index: {}]  }
   0x1   :  { %13 = vsyncpa [#allocation3 + $0x1], 0  ;;  %s945_s21 = smov 0   ;;  %s947_s22 = smov 0  }
   0x2   :  { %s949_s23 = smov 0   ;;  %s951_s24 = smov 0  }
   0x3   :  { %s953_s25 = smov 0   ;;  %s955_s26 = smov 0  }
   0x4 LB: > { %s677_s27 = sadd.s32 4294967295, %s903_s26   ;;  %s678_s28 = sadd.s32 4294967294, %s903_s26   ;;  %s903_s26 = sphi %s955_s26, %s19_s26   ;;  %s899_s25 = sphi %s953_s25, %s1107_s25   ;;  %s895_s24 = sphi %s951_s24, %s1106_s24   ;;  %s891_s23 = sphi %s949_s23, %s1105_s23   ;;  %s887_s22 = sphi %s947_s22, %s1104_s22   ;;  %s883_s21 = sphi %s945_s21, %s1103_s21  }
   0x5   : > { %s31_s29 = sadd.s32 1, %s899_s25  ;;  %s184_s30 = sadd.s32 1, %s891_s23 }
   0x6   : > { %p33_p0 = scmp.ge.s32.totalorder %s31_s29, 2  ;;  %p194_p1 = scmp.ne.s32.totalorder %s891_s23, %s887_s22 }
   0x7   : > { %p195_p2 = scmp.eq.s32.totalorder %s677_s27, 1  ;;  %p200_p3 = scmp.ne.s32.totalorder %s887_s22, %s883_s21 }
   0x8   : > { %s1109_s29 = smov (%p33_p0, %s31_s29), 0  ;;  %p201_p5 = scmp.eq.s32.totalorder %s678_s28, 1 }
   0x9   : > { %p985_p4 = por %p195_p2, %p194_p1  ;;  %s179_s8 = ssub.s32 %s899_s25, %s1109_s29 }
   0xa   : > { %p681_p6 = scmp.ge.s32.totalorder %s903_s26, 1  ;;  %p182_p7 = scmp.eq.s32.totalorder %s179_s8, 0 }
   0xb   : > { %p992_p8 = por %p201_p5, %p200_p3  ;;  %p267_p9 = scmp.lt.s32.totalorder %s903_s26, 3 }
   0xc   : > { %s998_s10 = scalar_select %p182_p7, %s891_s23, %s184_s30  }
   0xd   : > { %p268_p10 = pnand %p681_p6, %p267_p9 }
   0xe   : > { %p320_p11 = scmp.lt.s32.totalorder (!%p268_p10), %s895_s24, 1  ;;  %s905_s20 = smov (!%p268_p10), 8  }
   0xf   : > { %271 = sbr.rel (%p268_p10) target bundleno = 565 (0x235), region = 44  ;;  %s906_s27 = smov (!%p268_p10), 16  }
  0x10   : > { %s907_s18 = smov (!%p268_p10), 64   ;;  %s312_s15 = sand.u32 (!%p268_p10), 1, %s887_s22  }
  0x14   : > { %s321_s11 = scalar_select %p320_p11, %s895_s24, 1  ;;  %vm353_vm0 = vcmask 1046528   ;;  %vm368_vm1 = vcmask 1045504   ;;  %v395_v15 = vld [vmem:[%s1096_s2 + $0x8] sm:$0xf]  ;;  %vm416_vm2 = vcmask 1043456  }
  0x15   : > { %v405_v16 = vunpack.c.l.b16 %v395_v15  ;;  %v724_v19 = vld [vmem:[%s1096_s2] sm:$0xff]  ;;  %vm383_vm3 = vcmask 64512   ;;  %vm387_vm4 = vcmask 130048   ;;  %vm409_vm5 = vcmask 195584   ;;  %v730_v36 = vld [vmem:[%s1098_s4 + $0x28] sm:$0xff]  ;;  %v728_v61 = vld [vmem:[%s1098_s4 + $0x18] sm:$0xff] }
  0x16   : > { %s740_s12 = smul.u32 24, %s321_s11  ;;  %734 = vmatpush.bf16.msra.mxu2 %v730_v36  ;;  %v729_v37 = vld [vmem:[%s1098_s4 + $0x20] sm:$0xff]  ;;  %543 = vmatpush.bf16.msra.mxu1 %v730_v36  ;;  %v727_v62 = vld [vmem:[%s1098_s4 + $0x10] sm:$0xff]  ;;  %v726_v63 = vld [vmem:[%s1098_s4 + $0x8] sm:$0xff]  ;;  %vm476_vm6 = vcmask 523264   ;;  %vm472_vm7 = vcmask 261120  }
  0x17   : > { %v407_v17 = vpack.c.b16 %v405_v16, %v405_v16  ;;  %v823_v38 = vld [vmem:[%s1097_s3] ss:$0 sm:$0xff]  ;;  %vm534_vm8 = vcmask 785408  }
  0x18   : > { %s723_s13 = sadd.s32 16, %s740_s12  ;;  %s327_s16 = scalar_lea.vmem %s1094_s0, %s740_s12 }
  0x19   : > { %s342_s19 = scalar_lea.vmem %s1095_s1, %s723_s13  ;;  %v347_v0 = vld [vmem:[%s327_s16] sm:$0xff]  ;;  %v348_v1 = vld [vmem:[%s327_s16 + $0x8] sm:$0xff]  ;;  %v418_v18 = vsel %vm416_vm2, %v407_v17, 0  ;;  %s563_s13 = scalar_lea.sflag [#allocation3], %s312_s15 }
  0x1a   : > { %v349_v2 = vld [vmem:[%s342_s19] sm:$0xff]  ;;  %v354_v3 = vrot.slane %v347_v0, 1  ;;  %v355_v4 = vrot.slane %v348_v1, 1  ;;  %v369_v9 = vrot.slane %v347_v0, 2  ;;  %v370_v10 = vrot.slane %v348_v1, 2  ;;  %732 = vmatpush.bf16.msra.mxu3 %v418_v18  ;;  %426 = vmatpush.bf16.msra.mxu0 %v418_v18  ;;  %s908_s19 = smov 32  }
  0x1b   : > { %v357_v5 = vrot.slane %v349_v2, 1  ;;  %v372_v8 = vrot.slane %v349_v2, 2  ;;  %735 = vmatpush.bf16.msra.mxu2 %v729_v37  ;;  %544 = vmatpush.bf16.msra.mxu1 %v729_v37  ;;  %v824_v18 = vld [vmem:[%s1099_s5] ss:$0 sm:$0xff] }
  0x1c   : > { %v356_v6 = vsel %vm353_vm0, %v354_v3, %v355_v4  ;;  %v371_v12 = vsel %vm368_vm1, %v369_v9, %v370_v10 }
  0x1d   : > { %363 = vrot.lane.b32.xlu1 %v357_v5, %s905_s20  ;;  %v358_v7 = vsel %vm353_vm0, %v355_v4, %v357_v5  ;;  %v373_v13 = vsel %vm368_vm1, %v370_v10, %v372_v8 }
  0x1e   : > { %v803_v11 = vpack.i.bf16 %v358_v7, %v356_v6  ;;  %v808_v14 = vpack.i.bf16 %v373_v13, %v371_v12  ;;  %733 = vmatpush.bf16.msra.mxu3 %v724_v19  ;;  %427 = vmatpush.bf16.msra.mxu0 %v724_v19 }
  0x1f   : > { %736 = vmatpush.bf16.msra.mxu2 %v728_v61  ;;  %545 = vmatpush.bf16.msra.mxu1 %v728_v61 }
  0x20   : > { %804 = vrot.lane.b32.xlu0 %v803_v11, %s905_s20 }
  0x23   : > { %737 = vmatpush.bf16.msra.mxu2 %v727_v62  ;;  %546 = vmatpush.bf16.msra.mxu1 %v727_v62 }
  0x25   : > { %378 = vrot.lane.b32.xlu1 %v372_v8, %s906_s27 }
  0x27   : > { %738 = vmatpush.bf16.msra.mxu2 %v726_v63  ;;  %547 = vmatpush.bf16.msra.mxu1 %v726_v63 }
  0x28   : > { %809 = vrot.lane.b32.xlu0 %v808_v14, %s906_s27 }
  0x8f   : > { %v364_v20 = vpop.permute.xlu1 %363 }
  0x90   : > { %v386_v22 = vsel %vm383_vm3, %v349_v2, %v364_v20 }
  0x92   : > { %v805_v21 = vpop.permute.xlu0 %804 }
  0x93   : > { %v807_v24 = vunpack.i.h.bf16 %v805_v21  ;;  %v806_v25 = vunpack.i.l.bf16 %v805_v21 }
  0x95   : > { %v385_v31 = vsel %vm383_vm3, %v348_v1, %v807_v24  ;;  %v384_v32 = vsel %vm383_vm3, %v347_v0, %v806_v25  ;;  %v725_v0 = vld [vmem:[%s1098_s4] sm:$0xff] }
  0x96   : > { %739 = vmatpush.bf16.msra.mxu2 %v725_v0  ;;  %548 = vmatpush.bf16.msra.mxu1 %v725_v0 }
  0x97   : > { %v379_v23 = vpop.permute.xlu1 %378 }
  0x98   : > { %v390_v26 = vsel %vm387_vm4, %v386_v22, %v379_v23 }
  0x99   : > { %v392_v27 = vpack.c.bf16 %v390_v26, %v390_v26 }
  0x9a   : > { %v810_v28 = vpop.permute.xlu0 %809 }
  0x9b   : > { %v812_v29 = vunpack.i.h.bf16 %v810_v28  ;;  %v811_v30 = vunpack.i.l.bf16 %v810_v28  ;;  %690 = vmatmul.msk.bf16.vlgmr.msra.gmra.mxu3 %vm409_vm5, %v392_v27 }
  0x9d   : > { %v388_v33 = vsel %vm387_vm4, %v384_v32, %v811_v30  ;;  %v389_v34 = vsel %vm387_vm4, %v385_v31, %v812_v29 }
  0x9e   : > { %v391_v35 = vpack.c.bf16 %v389_v34, %v388_v33 }
  0xa0   : > { %689 = vmatmul.msk.bf16.vlgmr.msra.gmra.mxu0 %vm409_vm5, %v391_v35 }
 0x11d   : > { %v429_v39 = vpop.f32.mrf.mxu0 }
 0x11e   : > { %v434_v40 = vpop.f32.mrf.mxu3  ;;  %v430_v42 = vadd.f32 %v823_v38, %v429_v39 }
 0x11f   : > { %v435_v41 = vadd.f32 %v823_v38, %v434_v40 }
 0x120   : > { %v438_v45 = vmax.f32 %v430_v42, 0.0 }
 0x121   : > { %v440_v43 = vmax.f32 %v435_v41, 0.0 }
 0x122   : > { %v444_v50 = vrot.slane %v438_v45, 1  ;;  %v458_v51 = vrot.slane %v438_v45, 2 }
 0x123   : > { %v461_v44 = vrot.slane %v440_v43, 2  ;;  %v447_v52 = vrot.slane %v440_v43, 1 }
 0x125   : > { %467 = vrot.lane.b32.xlu1 %v461_v44, %s907_s18  ;;  %v431_v46 = vpop.f32.mrf.mxu0 }
 0x126   : > { %v432_v47 = vadd.f32 %v823_v38, %v431_v46  ;;  %v436_v48 = vpop.f32.mrf.mxu3 }
 0x128   : > { %v439_v49 = vmax.f32 %v432_v47, 0.0 }
 0x12a   : > { %v445_v53 = vrot.slane %v439_v49, 1  ;;  %v459_v54 = vrot.slane %v439_v49, 2 }
 0x12c   : > { %v460_v55 = vsel %vm368_vm1, %v458_v51, %v459_v54  ;;  %v462_v56 = vsel %vm368_vm1, %v459_v54, %v461_v44  ;;  %v446_v57 = vsel %vm353_vm0, %v444_v50, %v445_v53  ;;  %v448_v58 = vsel %vm353_vm0, %v445_v53, %v447_v52 }
 0x12d   : > { %v818_v59 = vpack.i.bf16 %v462_v56, %v460_v55  ;;  %v813_v60 = vpack.i.bf16 %v448_v58, %v446_v57 }
 0x12f   : > { %819 = vrot.lane.b32.xlu0 %v818_v59, %s907_s18  ;;  %814 = vrot.lane.b32.xlu2 %v813_v60, %s908_s19  ;;  %s682_s18 = sshll.u32 %s312_s15, 4 }
 0x130   : > { %s314_s27 = scalar_lea.vmem [#allocation2], %s682_s18  ;;  %s845_s18 = scalar_lea.hbm %s1100_s6, 32 }
 0x131   : > { %s577_s11 = sshll.u32 %s314_s27, 4  ;;  %s578_s11 = int_to_ptr.vmem [resolvable:$true] %s577_s11 }
 0x137   : > { %453 = vrot.lane.b32.xlu2 %v447_v52, %s908_s19  ;;  %s731_s19 = sshll.u32 %s895_s24, 4 }
 0x138   : > { %s576_s8 = scalar_lea.hbm %s1100_s6, %s731_s19 }
 0x139   : > { %s579_s12 = sshll.u32 %s576_s8, 4  ;;  %s580_s12 = int_to_ptr.hbm [resolvable:$true] %s579_s12 }
 0x13a   : > { %s839_s24 = sshra.s32 %s580_s12, 4  ;;  %s840_s24 = int_to_ptr.hbm [resolvable:$true] %s839_s24 }
 0x13b   : > { %s841_s14 = scalar_lea.hbm %s840_s24, 16  ;;  %p846_p1 = scmp.lt.s32.totalorder %s840_s24, %s1100_s6 }
 0x13c   : > { %p842_p12 = scmp.ne.s32.totalorder %s840_s24, %s841_s14  ;;  %p847_p2 = scmp.lt.s32.totalorder %s845_s18, %s841_s14 }
 0x13e   : > { %p843_p13 = pnand %p842_p12, %p985_p4  ;;  %p848_p3 = por %p847_p2, %p846_p1 }
 0x140   : > { %p844_p0 = pneg %p843_p13 }
 0x142   : > { %p849_p5 = pnand %p848_p3, %p844_p0 }
 0x189   : > { %v815_v1 = vpop.permute.xlu2 %814 }
 0x18a   : > { %v817_v7 = vunpack.i.h.bf16 %v815_v1  ;;  %v816_v8 = vunpack.i.l.bf16 %v815_v1 }
 0x18c   : > { %v474_v12 = vsel %vm472_vm7, %v439_v49, %v817_v7  ;;  %v473_v13 = vsel %vm472_vm7, %v438_v45, %v816_v8 }
 0x191   : > { %v454_v2 = vpop.permute.xlu2 %453 }
 0x192   : > { %v475_v3 = vsel %vm472_vm7, %v440_v43, %v454_v2 }
 0x197   : > { %v468_v4 = vpop.permute.xlu1 %467 }
 0x198   : > { %v479_v5 = vsel %vm476_vm6, %v475_v3, %v468_v4 }
 0x199   : > { %v481_v6 = vpack.c.bf16 %v479_v5, %v479_v5 }
 0x19b   : > { %716 = vmatmul.msk.bf16.vlgmr.msra.gmra.mxu2 %vm534_vm8, %v481_v6 }
 0x1a1   : > { %v820_v9 = vpop.permute.xlu0 %819 }
 0x1a2   : > { %v822_v10 = vunpack.i.h.bf16 %v820_v9  ;;  %v821_v11 = vunpack.i.l.bf16 %v820_v9 }
 0x1a4   : > { %v477_v14 = vsel %vm476_vm6, %v473_v13, %v821_v11  ;;  %v478_v15 = vsel %vm476_vm6, %v474_v12, %v822_v10 }
 0x1a5   : > { %v480_v16 = vpack.c.bf16 %v478_v15, %v477_v14 }
 0x1a7   : > { %715 = vmatmul.msk.bf16.vlgmr.msra.gmra.mxu1 %vm534_vm8, %v480_v16 }
 0x21e   : > { %v555_v17 = vpop.f32.mrf.mxu2 }
 0x224   : > { %v550_v19 = vpop.f32.mrf.mxu1 }
 0x225   : > { %v551_v20 = vadd.f32 %v824_v18, %v550_v19 }
 0x226   : > { %v556_v21 = vpop.f32.mrf.mxu2 }
 0x227   : > { %v558_v22 = vmax.f32 %v551_v20, 0.0 }
 0x229   : > { %560 = vst.msk [vmem:[%s314_s27] sm:$0xff] %vm472_vm7, %v558_v22 }
 0x22c   : > { %v552_v23 = vpop.f32.mrf.mxu1 }
 0x22d   : > { %v553_v24 = vadd.f32 %v824_v18, %v552_v23 }
 0x22f   : > { %v559_v25 = vmax.f32 %v553_v24, 0.0 }
 0x231   : > { %561 = vst.msk [vmem:[%s314_s27 + $0x8] sm:$0xff] %vm472_vm7, %v559_v25 }
 0x232   : > { %852 = shalt.err (!%p849_p5)
}
 0x233   : > { %s909_s15 = smov 128  }
 0x234   : > { %742 = dma.vmem_to_hbm [thread:$0]  (%p985_p4), %s578_s11, 256, %s580_s12, %s563_s13, %s909_s15, %s909_s15, %s905_s20  }
 0x235 PF: > { %p749_p6 = scmp.ge.s32.totalorder %s903_s26, 2  ;;  %s594_s27 = sand.u32 1, %s883_s21  }
 0x236   : > { %s595_s30 = scalar_lea.sflag [#allocation3], %s594_s27 }
 0x237   : > { %p745_p7 = pnand %p749_p6, %p992_p8 }
 0x239   : > { %p746_p9 = pneg %p745_p7 }
 0x23b   : > { %878 = dma.done.wait (%p746_p9), %s595_s30, 256  }
 0x23c   : > { %880 = vsyncadd (%p746_p9), %s595_s30, 4294967040  ;;  %s19_s26 = sadd.s32 1, %s903_s26   ;;  %s1103_s21 = smov %s887_s22 }
 0x23d   : > { %p16_p10 = scmp.ge.s32.totalorder %s19_s26, 4   ;;  %s1104_s22 = smov %s891_s23 }
 0x23e   : > { %s1105_s23 = smov %s998_s10  ;;  %s1106_s24 = smov %s899_s25 }
 0x23f   : > { %s1107_s25 = smov %s1109_s29  ;;  %18 = sbr.rel (!%p16_p10) target bundleno = 4 (0x4), region = 82 }
 0x244   :  { %601 = vsyncpa [#allocation3], 1 }
 0x245   :  { %603 = vsyncpa [#allocation3 + $0x1], 1 }

</bundles_post_ra>
